<compile_context>
chip_gen: v7x
topology: tpu7x:2x2x1
jax: 0.10.0
libtpu: 0.0.40
codegen_flags: <defaults>
</compile_context>

<pallas_src>
import functools

import jax
import jax.numpy as jnp
from jax.experimental import pallas as pl
from jax.experimental.pallas import tpu as pltpu


# ----------------------------------------------------------------------------
# Pallas kernel A (cold path, one grid step): WL features for the filter graphs.
#   input : filt_adj (filters, n, n), filt_lab (filters, n, L)
#   output: phi_f (filters, (n_iter+1)*L)
# ----------------------------------------------------------------------------
def _filter_wl_kernel(a_ref, y_ref, phi_ref, *, n_iter):
    a = a_ref[...].astype(jnp.bfloat16)            # {0,1} adjacency: exact in bf16
    cur = y_ref[...].astype(jnp.float32)           # (filters, n, L)
    hists = []
    for it in range(n_iter + 1):
        hists.append(jnp.sum(cur, axis=1))         # (filters, L) label histogram
        if it < n_iter:
            agg = jnp.einsum("bij,bjl->bil", a, cur.astype(jnp.bfloat16),
                             preferred_element_type=jnp.float32) + cur
            denom = jnp.sum(agg, axis=-1, keepdims=True)
            cur = agg * pl.reciprocal(jnp.maximum(denom, 1e-9), approx=True)
    # TODO(synk): exact WL uses injective hashing of (label, neighbor-multiset);
    # this continuous propagation proxy keeps the alphabet fixed at L labels.
    phi_ref[...] = jnp.concatenate(hists, axis=-1)


def filter_wl_features(filt_adj, filt_lab, n_iter):
    filters, n, _ = filt_adj.shape
    L = filt_lab.shape[-1]
    F = (n_iter + 1) * L
    kernel = functools.partial(_filter_wl_kernel, n_iter=n_iter)
    return pl.pallas_call(
        kernel,
        out_shape=jax.ShapeDtypeStruct((filters, F), jnp.float32),
        grid=(1,),
        in_specs=[
            pl.BlockSpec((filters, n, n), lambda i: (0, 0, 0)),
            pl.BlockSpec((filters, n, L), lambda i: (0, 0, 0)),
        ],
        out_specs=pl.BlockSpec((filters, F), lambda i: (0, 0)),
    )(filt_adj, filt_lab)


# ----------------------------------------------------------------------------
# Pallas kernel B (hot path, fused): ego-WL features + normalized similarity.
#   inputs : A (N, N), Y (N, L), reach rows (TB, N),
#            pfT = pre-normalized filter features, laid out (n_iter+1, L, 128) bf16
#   output : sim rows (TB, 128)  (columns >= filters are zero padding)
# ----------------------------------------------------------------------------
def _ego_wl_sim_kernel(a_ref, y_ref, reach_ref, pfT_ref, o_ref, *, n_iter):
    r = reach_ref[...]                                                  # (TB, N)
    # ego-masked adjacency / labels built in-kernel (no O(N^3) HBM tensors)
    a = (a_ref[...][None, :, :] * r[:, :, None] * r[:, None, :]).astype(jnp.bfloat16)
    cur = y_ref[...][None, :, :] * r[:, :, None]                        # (TB, N, L) f32

    tb = r.shape[0]
    f_pad = o_ref.shape[-1]
    sim = jnp.zeros((tb, f_pad), jnp.float32)     # <phi_e, phi_f/||phi_f||>, accumulated
    ne = jnp.zeros((tb, 1), jnp.float32)          # ||phi_e||^2, accumulated

    for it in range(n_iter + 1):
        hist = jnp.sum(cur, axis=1)                                     # (TB, L)
        ne = ne + jnp.sum(hist * hist, axis=-1, keepdims=True)
        sim = sim + jnp.dot(hist.astype(jnp.bfloat16), pfT_ref[it],
                            preferred_element_type=jnp.float32)
        if it < n_iter:
            agg = jnp.einsum("bij,bjl->bil", a, cur.astype(jnp.bfloat16),
                             preferred_element_type=jnp.float32) + cur
            denom = jnp.sum(agg, axis=-1, keepdims=True)
            cur = agg * pl.reciprocal(jnp.maximum(denom, 1e-9), approx=True)

    inv = jnp.where(ne > 0.0, jax.lax.rsqrt(ne), 0.0)   # nan_to_num(0) for degenerate rows
    o_ref[...] = sim * inv                              # lane-dense (TB, 128) store


def ego_wl_similarity(A, Y, reach, pfT, n_iter, *, tb=8):
    N = A.shape[0]
    L = Y.shape[-1]
    lane_pad = pfT.shape[-1]
    n_blocks = -(-N // tb)
    n_padded = n_blocks * tb
    if n_padded != N:
        reach = jnp.pad(reach, ((0, n_padded - N), (0, 0)))
    kernel = functools.partial(_ego_wl_sim_kernel, n_iter=n_iter)
    out = pl.pallas_call(
        kernel,
        out_shape=jax.ShapeDtypeStruct((n_padded, lane_pad), jnp.float32),
        grid=(n_blocks,),
        in_specs=[
            pl.BlockSpec((N, N), lambda i: (0, 0)),
            pl.BlockSpec((N, L), lambda i: (0, 0)),
            pl.BlockSpec((tb, N), lambda i: (i, 0)),
            pl.BlockSpec((n_iter + 1, L, lane_pad), lambda i: (0, 0, 0)),
        ],
        out_specs=pl.BlockSpec((tb, lane_pad), lambda i: (i, 0)),
        compiler_params=pltpu.CompilerParams(dimension_semantics=("parallel",)),
    )(A, Y, reach, pfT)
    return out[:N]


# ----------------------------------------------------------------------------
# Plain-JAX glue (graph preprocessing: densify, k-hop reach, largest connected comp.)
# ----------------------------------------------------------------------------
def dense_adjacency(edge_index, num_nodes):
    A = jnp.zeros((num_nodes, num_nodes), jnp.float32)
    A = A.at[edge_index[0], edge_index[1]].set(1.0)
    return jnp.maximum(A, A.T)   # symmetrize (undirected reachability, as in k_hop_subgraph use)


def khop_reach(A, hops):
    n = A.shape[0]
    reach = jnp.eye(n, dtype=jnp.float32)
    for _ in range(hops):
        reach = ((reach + reach @ A) > 0).astype(jnp.float32)
    return reach   # reach[i, j] = 1 iff node j is within `hops` of node i


def largest_cc_mask(Padj):
    # min-label propagation connected components; keep the largest component.
    n = Padj.shape[0]
    Aext = jnp.maximum(Padj, jnp.eye(n, dtype=Padj.dtype))
    lab0 = jnp.arange(n, dtype=jnp.float32)

    def body(_, lab):
        nbr = jnp.where(Aext > 0, lab[None, :], jnp.inf)
        return jnp.min(nbr, axis=1)

    lab = jax.lax.fori_loop(0, n, body, lab0)
    sizes = jnp.sum((lab[None, :] == lab[:, None]).astype(jnp.float32), axis=1)
    max_size = jnp.max(sizes)
    best_label = jnp.min(jnp.where(sizes == max_size, lab, jnp.inf))
    # TODO(synk): scipy max_comp drops isolated nodes absent from the edge list; here
    # an all-isolated filter keeps one node, which only affects a degenerate corner case.
    return (lab == best_label).astype(jnp.float32)


class GKernelPallas:
    """Forward-pass equivalent of the PyTorch GKernel module (kernels='wl')."""

    def __init__(self, nodes, labels, filters=8, hops=3, n_iter=3, *, key):
        self.hops = hops
        self.n_iter = n_iter
        self.filters = filters
        self.labels = labels
        k_p, k_x = jax.random.split(key)
        # P: random symmetric {0,1} adjacency, zero diagonal (as in the torch __init__).
        A = jax.random.uniform(k_p, (filters, nodes, nodes), dtype=jnp.float32)
        A = (A + jnp.swapaxes(A, -2, -1) > 1).astype(jnp.float32)
        A = A * (1.0 - jnp.eye(nodes, dtype=jnp.float32))
        self.P = A
        # X: per-filter one-hot node labels.
        lab = jax.random.randint(k_x, (filters, nodes), 0, labels)
        self.X = jax.nn.one_hot(lab, labels, dtype=jnp.float32)
        # Parameters below participate only in backward in the reference; kept for parity.
        self.Xp = jnp.zeros((filters, nodes, labels), jnp.float32)
        self.Padd = jnp.zeros((filters, nodes, nodes), jnp.float32)
        self.Prem = jnp.zeros((filters, nodes, nodes), jnp.float32)

    def __call__(self, x, edge_index):
        N, L = x.shape
        A = dense_adjacency(edge_index, N)
        reach = khop_reach(A, self.hops)                                    # (N, N) egonet masks
        Y = jax.nn.one_hot(jnp.argmax(x, axis=-1), L, dtype=jnp.float32)    # node labels

        # filter graphs restricted to their largest connected component (max_comp).
        cc = jax.vmap(largest_cc_mask)(self.P)                              # (filters, nodes)
        filt_adj = self.P * cc[:, :, None] * cc[:, None, :]
        filt_lab = self.X * cc[:, :, None]

        # cold path: filter-graph WL features (one tiny batched Pallas call).
        phi_f = filter_wl_features(filt_adj, filt_lab, self.n_iter)         # (filters, F)

        # pre-normalize (cosine denominator; zero rows stay zero == nan_to_num) and pack
        # into a lane-dense, pre-transposed (n_iter+1, L, 128) bf16 weight.
        nf = jnp.sum(phi_f * phi_f, axis=-1, keepdims=True)
        phi_f_n = jnp.where(nf > 0,
                            phi_f * jax.lax.rsqrt(jnp.where(nf > 0, nf, 1.0)),
                            0.0)
        F = phi_f.shape[-1]
        lane_pad = 128
        pfT = jnp.zeros((F, lane_pad), jnp.float32).at[:, :self.filters].set(phi_f_n.T)
        pfT = pfT.reshape(self.n_iter + 1, L, lane_pad).astype(jnp.bfloat16)

        # hot path: fused ego-WL features + normalized similarity (single Pallas call).
        sim = ego_wl_similarity(A, Y, reach, pfT, self.n_iter, tb=8)        # (N, 128)
        convs = [sim[:, :self.filters]]                                     # one per graph kernel
        return jnp.concatenate(convs, axis=-1)                              # (N, filters)


if __name__ == "__main__":
    key = jax.random.PRNGKey(0)
    k_param, k_x, k_e1, k_e2 = jax.random.split(key, 4)

    N, LABELS, FILTER_NODES, FILTERS, HOPS = 16, 4, 8, 8, 3

    model = GKernelPallas(nodes=FILTER_NODES, labels=LABELS, filters=FILTERS,
                          hops=HOPS, key=k_param)

    # deterministic small input graph: one-hot node labels + ring with random chords
    x = jax.nn.one_hot(jax.random.randint(k_x, (N,), 0, LABELS), LABELS, dtype=jnp.float32)
    ring_src = jnp.arange(N)
    ring_dst = (ring_src + 1) % N
    extra_src = jax.random.randint(k_e1, (8,), 0, N)
    extra_dst = jax.random.randint(k_e2, (8,), 0, N)
    edge_index = jnp.stack(
        [jnp.concatenate([ring_src, ring_dst, extra_src]),
         jnp.concatenate([ring_dst, ring_src, extra_dst])], axis=0)

    out = model(x, edge_index)
    out = jax.block_until_ready(out)
    assert out.shape == (N, FILTERS), out.shape
    assert out.dtype == jnp.float32
    print("KERNEL_OK")
</pallas_src>

<mosaic_0001>
module attributes {stable_mosaic.version = 11 : i64} {
  func.func @_filter_wl_kernel(%arg0: i32, %arg1: memref<8x8x8xf32, #tpu.memory_space<vmem>>, %arg2: memref<8x8x4xf32, #tpu.memory_space<vmem>>, %arg3: memref<8x16xf32, #tpu.memory_space<vmem>>) attributes {dimension_semantics = [#tpu.dimension_semantics<arbitrary>], iteration_bounds = array<i64: 1>, scalar_prefetch = 0 : i64, scratch_operands = 0 : i64, tpu.core_type = #tpu.core_type<tc>, window_params = [{pipeline_mode = #tpu.pipeline_mode<synchronous>, transform_indices = @transform_0, window_bounds = array<i64: 8, 8, 8>}, {pipeline_mode = #tpu.pipeline_mode<synchronous>, transform_indices = @transform_1, window_bounds = array<i64: 8, 8, 4>}, {pipeline_mode = #tpu.pipeline_mode<synchronous>, transform_indices = @transform_2, window_bounds = array<i64: 8, 16>}]} {
    %c0 = arith.constant 0 : index
    %c0_0 = arith.constant 0 : index
    %c0_1 = arith.constant 0 : index
    %0 = vector.load %arg1[%c0, %c0_0, %c0_1] : memref<8x8x8xf32, #tpu.memory_space<vmem>>, vector<8x8x8xf32>
    %1 = arith.truncf %0 : vector<8x8x8xf32> to vector<8x8x8xbf16>
    %c0_2 = arith.constant 0 : index
    %c0_3 = arith.constant 0 : index
    %c0_4 = arith.constant 0 : index
    %2 = vector.load %arg2[%c0_2, %c0_3, %c0_4] : memref<8x8x4xf32, #tpu.memory_space<vmem>>, vector<8x8x4xf32>
    %cst = arith.constant dense<0.000000e+00> : vector<8x4xf32>
    %3 = vector.multi_reduction <add>, %2, %cst [1] : vector<8x8x4xf32> to vector<8x4xf32>
    %4 = arith.truncf %2 : vector<8x8x4xf32> to vector<8x8x4xbf16>
    "tpu.trace_start"() <{level = 10 : i32, message = "bij,bjl->bil"}> : () -> ()
    %cst_5 = arith.constant dense<0.000000e+00> : vector<8x8x4xf32>
    %5 = tpu.matmul %1, %4, %cst_5 {dimension_numbers = #tpu.dot_dimension_numbers<[2], [1], [1], [2], [0, 0, 0, 1, 1, 2], [0], [0]>} : vector<8x8x8xbf16>, vector<8x8x4xbf16>, vector<8x8x4xf32> -> vector<8x8x4xf32>
    "tpu.trace_stop"() : () -> ()
    %6 = arith.addf %5, %2 : vector<8x8x4xf32>
    %cst_6 = arith.constant dense<0.000000e+00> : vector<8x8xf32>
    %7 = vector.multi_reduction <add>, %6, %cst_6 [2] : vector<8x8x4xf32> to vector<8x8xf32>
    %8 = vector.shape_cast %7 : vector<8x8xf32> to vector<8x8x1xf32>
    %cst_7 = arith.constant 9.99999971E-10 : f32
    %9 = vector.broadcast %cst_7 : f32 to vector<8x8x1xf32>
    %10 = arith.maximumf %8, %9 : vector<8x8x1xf32>
    %11 = tpu.reciprocal %10 {approx = true} : vector<8x8x1xf32> -> vector<8x8x1xf32>
    %12 = vector.broadcast %11 : vector<8x8x1xf32> to vector<8x8x4xf32>
    %13 = arith.mulf %6, %12 : vector<8x8x4xf32>
    %cst_8 = arith.constant dense<0.000000e+00> : vector<8x4xf32>
    %14 = vector.multi_reduction <add>, %13, %cst_8 [1] : vector<8x8x4xf32> to vector<8x4xf32>
    %15 = arith.truncf %13 : vector<8x8x4xf32> to vector<8x8x4xbf16>
    "tpu.trace_start"() <{level = 10 : i32, message = "bij,bjl->bil"}> : () -> ()
    %cst_9 = arith.constant dense<0.000000e+00> : vector<8x8x4xf32>
    %16 = tpu.matmul %1, %15, %cst_9 {dimension_numbers = #tpu.dot_dimension_numbers<[2], [1], [1], [2], [0, 0, 0, 1, 1, 2], [0], [0]>} : vector<8x8x8xbf16>, vector<8x8x4xbf16>, vector<8x8x4xf32> -> vector<8x8x4xf32>
    "tpu.trace_stop"() : () -> ()
    %17 = arith.addf %16, %13 : vector<8x8x4xf32>
    %cst_10 = arith.constant dense<0.000000e+00> : vector<8x8xf32>
    %18 = vector.multi_reduction <add>, %17, %cst_10 [2] : vector<8x8x4xf32> to vector<8x8xf32>
    %19 = vector.shape_cast %18 : vector<8x8xf32> to vector<8x8x1xf32>
    %cst_11 = arith.constant 9.99999971E-10 : f32
    %20 = vector.broadcast %cst_11 : f32 to vector<8x8x1xf32>
    %21 = arith.maximumf %19, %20 : vector<8x8x1xf32>
    %22 = tpu.reciprocal %21 {approx = true} : vector<8x8x1xf32> -> vector<8x8x1xf32>
    %23 = vector.broadcast %22 : vector<8x8x1xf32> to vector<8x8x4xf32>
    %24 = arith.mulf %17, %23 : vector<8x8x4xf32>
    %cst_12 = arith.constant dense<0.000000e+00> : vector<8x4xf32>
    %25 = vector.multi_reduction <add>, %24, %cst_12 [1] : vector<8x8x4xf32> to vector<8x4xf32>
    %26 = arith.truncf %24 : vector<8x8x4xf32> to vector<8x8x4xbf16>
    "tpu.trace_start"() <{level = 10 : i32, message = "bij,bjl->bil"}> : () -> ()
    %cst_13 = arith.constant dense<0.000000e+00> : vector<8x8x4xf32>
    %27 = tpu.matmul %1, %26, %cst_13 {dimension_numbers = #tpu.dot_dimension_numbers<[2], [1], [1], [2], [0, 0, 0, 1, 1, 2], [0], [0]>} : vector<8x8x8xbf16>, vector<8x8x4xbf16>, vector<8x8x4xf32> -> vector<8x8x4xf32>
    "tpu.trace_stop"() : () -> ()
    %28 = arith.addf %27, %24 : vector<8x8x4xf32>
    %cst_14 = arith.constant dense<0.000000e+00> : vector<8x8xf32>
    %29 = vector.multi_reduction <add>, %28, %cst_14 [2] : vector<8x8x4xf32> to vector<8x8xf32>
    %30 = vector.shape_cast %29 : vector<8x8xf32> to vector<8x8x1xf32>
    %cst_15 = arith.constant 9.99999971E-10 : f32
    %31 = vector.broadcast %cst_15 : f32 to vector<8x8x1xf32>
    %32 = arith.maximumf %30, %31 : vector<8x8x1xf32>
    %33 = tpu.reciprocal %32 {approx = true} : vector<8x8x1xf32> -> vector<8x8x1xf32>
    %34 = vector.broadcast %33 : vector<8x8x1xf32> to vector<8x8x4xf32>
    %35 = arith.mulf %28, %34 : vector<8x8x4xf32>
    %cst_16 = arith.constant dense<0.000000e+00> : vector<8x4xf32>
    %36 = vector.multi_reduction <add>, %35, %cst_16 [1] : vector<8x8x4xf32> to vector<8x4xf32>
    %37 = tpu.concatenate %3, %14, %25, %36 in 1 : vector<8x4xf32>, vector<8x4xf32>, vector<8x4xf32>, vector<8x4xf32> -> vector<8x16xf32>
    %c0_17 = arith.constant 0 : index
    %c0_18 = arith.constant 0 : index
    %38 = vector.load %arg3[%c0_17, %c0_18] : memref<8x16xf32, #tpu.memory_space<vmem>>, vector<8x16xf32>
    tpu.vector_store %arg3[%c0_17, %c0_18], %37 {strides = array<i32>} : memref<8x16xf32, #tpu.memory_space<vmem>>, vector<8x16xf32>,
    return
  }
  func.func @transform_0(%arg0: i32) -> (i32, i32, i32) {
    %c0_i32 = arith.constant 0 : i32
    %c0_i32_0 = arith.constant 0 : i32
    %c0_i32_1 = arith.constant 0 : i32
    %c0_i32_2 = arith.constant 0 : i32
    return %c0_i32, %c0_i32_0, %c0_i32_1 : i32, i32, i32
  }
  func.func @transform_1(%arg0: i32) -> (i32, i32, i32) {
    %c0_i32 = arith.constant 0 : i32
    %c0_i32_0 = arith.constant 0 : i32
    %c0_i32_1 = arith.constant 0 : i32
    %c0_i32_2 = arith.constant 0 : i32
    return %c0_i32, %c0_i32_0, %c0_i32_1 : i32, i32, i32
  }
  func.func @transform_2(%arg0: i32) -> (i32, i32) {
    %c0_i32 = arith.constant 0 : i32
    %c0_i32_0 = arith.constant 0 : i32
    %c0_i32_1 = arith.constant 0 : i32
    return %c0_i32, %c0_i32_0 : i32, i32
  }
}

</mosaic_0001>

<bundles_post_ra>
// kernel: tpu_custom_call.1
= control target key start
LH: loop header
LB: loop body
LE: loop exit
PB: predicated region body
PF: predicated region fallthrough
CT: control target
= control target key end

     0   :  { %vm106_vm0 = vcmask 1043456   ;;  %v1887_v2 = vmov 0.0   ;;  %vm1888_vm1 = vmmov 0   ;;  %vm102_vm2 = vcmask 64512   ;;  %s2484_s0 = inlined_call_operand.vmem [shape: f32[8,8,8], index: 0, kind: input, shape index: {}]   ;;  %s2485_s1 = inlined_call_operand.vmem [shape: f32[8,8,4], index: 1, kind: input, shape index: {}]   ;;  %s2486_s2 = inlined_call_operand.hbm [shape: f32[8,16], index: 2, kind: output, shape index: {}]  }
   0x1   :  { %v1911_v0 = vld [vmem:[%s2485_s1] sm:$0xff]  ;;  %v1916_v1 = vld [vmem:[%s2485_s1 + $0x8] sm:$0xff]  ;;  %1657 = vmatprep.subr.bf16.mxu0 %v1887_v2  ;;  %1663 = vmatprep.subr.bf16.mxu1 %v1887_v2  ;;  %v1933_v7 = vld [vmem:[%s2485_s1 + $0x10] sm:$0xff] }
   0x2   :  { %v94_v3 = vpack.c.bf16 %v1911_v0, %v1911_v0  ;;  %v95_v4 = vpack.c.bf16 %v1916_v1, %v1916_v1  ;;  %v13_v5 = vld [vmem:[%s2484_s0] sm:$0xff]  ;;  %v14_v6 = vld [vmem:[%s2484_s0 + $0x8] sm:$0xff]  ;;  %v1938_v8 = vld [vmem:[%s2485_s1 + $0x18] sm:$0xff]  ;;  %1659 = vmatprep.mubr.msk.bf16.mxu0 %vm1888_vm1, %v1887_v2  ;;  %1665 = vmatprep.mubr.msk.bf16.mxu1 %vm1888_vm1, %v1887_v2  ;;  %v96_v13 = vpack.c.bf16 %v1933_v7, %v1933_v7 }
   0x3   :  { %v1946_v11 = vpack.c.bf16 %v13_v5, %v13_v5  ;;  %v1948_v12 = vpack.c.bf16 %v14_v6, %v14_v6  ;;  %v97_v14 = vpack.c.bf16 %v1938_v8, %v1938_v8 }
   0x4   :  { %v108_v9 = vsel %vm106_vm0, %v94_v3, 0  ;;  %v154_v10 = vsel %vm106_vm0, %v95_v4, 0 }
   0x5   :  { %1658 = vmatpush3.bf16.msra.mxu0 %v108_v9  ;;  %1664 = vmatpush3.bf16.msra.mxu1 %v154_v10 }
   0x6   :  { %1669 = vmatprep.subr.bf16.mxu0 %v1887_v2  ;;  %1675 = vmatprep.subr.bf16.mxu1 %v1887_v2 }
   0x7   :  { %7 = vsyncpa [#allocation3], 0  ;;  %v200_v15 = vsel %vm106_vm0, %v96_v13, 0  ;;  %v1960_v16 = vld [vmem:[%s2485_s1 + $0x20] sm:$0xff]  ;;  %v1965_v17 = vld [vmem:[%s2485_s1 + $0x28] sm:$0xff]  ;;  %v246_v18 = vsel %vm106_vm0, %v97_v14, 0 }
   0x8   :  { %1660 = vmatmul.mubr.msk.bf16.vlgmr.msra.gmra.mrb[0].mxu0 %vm102_vm2, %v1946_v11  ;;  %1666 = vmatmul.mubr.msk.bf16.vlgmr.msra.gmra.mrb[0].mxu1 %vm102_vm2, %v1948_v12  ;;  %v15_v19 = vld [vmem:[%s2484_s0 + $0x10] sm:$0xff]  ;;  %v16_v20 = vld [vmem:[%s2484_s0 + $0x18] sm:$0xff]  ;;  %v98_v21 = vpack.c.bf16 %v1960_v16, %v1960_v16  ;;  %v99_v22 = vpack.c.bf16 %v1965_v17, %v1965_v17  ;;  %v17_v29 = vld [vmem:[%s2484_s0 + $0x20] sm:$0xff]  ;;  %vm37_vm3 = vcmask 31744   ;;  %vm1496_vm4 = vcmask 1041409   ;;  %s1890_s13 = smov 4  }
   0x9   :  { %1670 = vmatpush3.bf16.msra.mxu0 %v200_v15  ;;  %1676 = vmatpush3.bf16.msra.mxu1 %v246_v18  ;;  %v1988_v23 = vpack.c.bf16 %v15_v19, %v15_v19  ;;  %v1990_v24 = vpack.c.bf16 %v16_v20, %v16_v20  ;;  %v1997_v27 = vld [vmem:[%s2485_s1 + $0x30] sm:$0xff]  ;;  %v2002_v28 = vld [vmem:[%s2485_s1 + $0x38] sm:$0xff]  ;;  %v18_v30 = vld [vmem:[%s2484_s0 + $0x28] sm:$0xff]  ;;  %v2024_v33 = vpack.c.bf16 %v17_v29, %v17_v29  ;;  %vm1498_vm5 = vcmask 1042434   ;;  %s1891_s14 = smov 12  }
   0xa   :  { %1671 = vmatprep.mubr.msk.bf16.mxu0 %vm1888_vm1, %v1887_v2  ;;  %1677 = vmatprep.mubr.msk.bf16.mxu1 %vm1888_vm1, %v1887_v2  ;;  %v292_v25 = vsel %vm106_vm0, %v98_v21, 0  ;;  %v338_v26 = vsel %vm106_vm0, %v99_v22, 0  ;;  %v100_v31 = vpack.c.bf16 %v1997_v27, %v1997_v27  ;;  %v101_v32 = vpack.c.bf16 %v2002_v28, %v2002_v28  ;;  %v19_v37 = vld [vmem:[%s2484_s0 + $0x30] sm:$0xff]  ;;  %v20_v38 = vld [vmem:[%s2484_s0 + $0x38] sm:$0xff]  ;;  %s1889_s0 = smov 8  }
   0xb   :  { %1681 = vmatprep.subr.bf16.mxu0 %v1887_v2  ;;  %1687 = vmatprep.subr.bf16.mxu1 %v1887_v2  ;;  %v2026_v34 = vpack.c.bf16 %v18_v30, %v18_v30  ;;  %v2046_v39 = vpack.c.bf16 %v19_v37, %v19_v37  ;;  %v2048_v40 = vpack.c.bf16 %v20_v38, %v20_v38  ;;  %vm1500_vm6 = vcmask 1043459  }
   0xc   :  { %v384_v35 = vsel %vm106_vm0, %v100_v31, 0  ;;  %v430_v36 = vsel %vm106_vm0, %v101_v32, 0  ;;  %vm1502_vm7 = vcmask 1044484   ;;  %vm1504_vm8 = vcmask 1045509  }
   0xd   :  { %vm1506_vm9 = vcmask 1046534   ;;  %vm1508_vm10 = vcmask 1047559   ;;  %vm1567_vm11 = vcmask 97280   ;;  %vm1569_vm12 = vcmask 130048  }
  0x10   :  { %1672 = vmatmul.mubr.msk.bf16.vlgmr.msra.gmra.mrb[4].mxu0 %vm102_vm2, %v1988_v23  ;;  %1678 = vmatmul.mubr.msk.bf16.vlgmr.msra.gmra.mrb[4].mxu1 %vm102_vm2, %v1990_v24 }
  0x11   :  { %1682 = vmatpush3.bf16.msra.mxu0 %v292_v25  ;;  %1688 = vmatpush3.bf16.msra.mxu1 %v338_v26 }
  0x12   :  { %1683 = vmatprep.mubr.msk.bf16.mxu0 %vm1888_vm1, %v1887_v2  ;;  %1689 = vmatprep.mubr.msk.bf16.mxu1 %vm1888_vm1, %v1887_v2 }
  0x13   :  { %1693 = vmatprep.subr.bf16.mxu0 %v1887_v2  ;;  %1699 = vmatprep.subr.bf16.mxu1 %v1887_v2 }
  0x18   :  { %1684 = vmatmul.mubr.msk.bf16.vlgmr.msra.gmra.mrb[8].mxu0 %vm102_vm2, %v2024_v33  ;;  %1690 = vmatmul.mubr.msk.bf16.vlgmr.msra.gmra.mrb[8].mxu1 %vm102_vm2, %v2026_v34 }
  0x19   :  { %1694 = vmatpush3.bf16.msra.mxu0 %v384_v35  ;;  %1700 = vmatpush3.bf16.msra.mxu1 %v430_v36 }
  0x1a   :  { %1695 = vmatprep.mubr.msk.bf16.mxu0 %vm1888_vm1, %v1887_v2  ;;  %1701 = vmatprep.mubr.msk.bf16.mxu1 %vm1888_vm1, %v1887_v2 }
  0x1b   :  { %1705 = vmatprep.subr.bf16.mxu0 %v1887_v2  ;;  %1711 = vmatprep.subr.bf16.mxu1 %v1887_v2 }
  0x20   :  { %1696 = vmatmul.mubr.msk.bf16.vlgmr.msra.gmra.mrb[12].mxu0 %vm102_vm2, %v2046_v39  ;;  %1702 = vmatmul.mubr.msk.bf16.vlgmr.msra.gmra.mrb[12].mxu1 %vm102_vm2, %v2048_v40 }
  0x21   :  { %1707 = vmatprep.mubr.msk.bf16.mxu0 %vm1888_vm1, %v1887_v2  ;;  %1713 = vmatprep.mubr.msk.bf16.mxu1 %vm1888_vm1, %v1887_v2 }
  0xdb   :  { %v144_v41 = vpop.f32.mrb[0].mxu0  ;;  %v190_v42 = vpop.f32.mrb[0].mxu1 }
  0xdc   :  { %v2059_v43 = vadd.f32 %v144_v41, %v1911_v0  ;;  %v1661_v44 = vpop.f32.mrb[1].mxu0  ;;  %v2062_v45 = vadd.f32 %v190_v42, %v1916_v1  ;;  %v1667_v46 = vpop.f32.mrb[1].mxu1 }
  0xdd   :  { %v147_v47 = vpop.f32.mrb[2].mxu0  ;;  %v193_v48 = vpop.f32.mrb[2].mxu1 }
  0xde   :  { %v1662_v49 = vpop.f32.mrb[3].mxu0  ;;  %v1668_v50 = vpop.f32.mrb[3].mxu1  ;;  %v472_v51 = vsel %vm37_vm3, %v2059_v43, 0.0  ;;  %v475_v52 = vsel %vm37_vm3, %v2062_v45, 0.0 }
  0xdf   :  { %473 = vadd.xlane.f32.xlu0 %v472_v51 }
  0xe3   :  { %476 = vadd.xlane.f32.xlu0 %v475_v52  ;;  %v236_v53 = vpop.f32.mrb[4].mxu0  ;;  %v282_v54 = vpop.f32.mrb[4].mxu1 }
  0xe4   :  { %v2069_v55 = vadd.f32 %v236_v53, %v1933_v7  ;;  %v1673_v56 = vpop.f32.mrb[5].mxu0  ;;  %v2072_v57 = vadd.f32 %v282_v54, %v1938_v8  ;;  %v1679_v58 = vpop.f32.mrb[5].mxu1 }
  0xe5   :  { %v239_v59 = vpop.f32.mrb[6].mxu0  ;;  %v285_v60 = vpop.f32.mrb[6].mxu1 }
  0xe6   :  { %v1674_v61 = vpop.f32.mrb[7].mxu0  ;;  %v1680_v62 = vpop.f32.mrb[7].mxu1  ;;  %v478_v63 = vsel %vm37_vm3, %v2069_v55, 0.0  ;;  %v481_v0 = vsel %vm37_vm3, %v2072_v57, 0.0 }
  0xe7   :  { %479 = vadd.xlane.f32.xlu1 %v478_v63 }
  0xeb   :  { %v374_v1 = vpop.f32.mrb[8].mxu1  ;;  %482 = vadd.xlane.f32.xlu1 %v481_v0  ;;  %v328_v3 = vpop.f32.mrb[8].mxu0 }
  0xec   :  { %v2079_v4 = vadd.f32 %v374_v1, %v1965_v17  ;;  %v2082_v5 = vadd.f32 %v328_v3, %v1960_v16  ;;  %v1685_v6 = vpop.f32.mrb[9].mxu0  ;;  %v1691_v7 = vpop.f32.mrb[9].mxu1 }
  0xed   :  { %v331_v8 = vpop.f32.mrb[10].mxu0  ;;  %v377_v9 = vpop.f32.mrb[10].mxu1 }
  0xee   :  { %v1686_v10 = vpop.f32.mrb[11].mxu0  ;;  %v1692_v13 = vpop.f32.mrb[11].mxu1  ;;  %v487_v14 = vsel %vm37_vm3, %v2079_v4, 0.0  ;;  %v484_v15 = vsel %vm37_vm3, %v2082_v5, 0.0 }
  0xef   :  { %488 = vadd.xlane.f32.xlu1 %v487_v14  ;;  %485 = vadd.xlane.f32.xlu0 %v484_v15 }
  0xf3   :  { %v420_v18 = vpop.f32.mrb[12].mxu0  ;;  %v466_v17 = vpop.f32.mrb[12].mxu1 }
  0xf4   :  { %v2089_v19 = vadd.f32 %v420_v18, %v1997_v27  ;;  %v2092_v16 = vadd.f32 %v466_v17, %v2002_v28  ;;  %v1697_v20 = vpop.f32.mrb[13].mxu0  ;;  %v1703_v21 = vpop.f32.mrb[13].mxu1 }
  0xf5   :  { %v423_v22 = vpop.f32.mrb[14].mxu0  ;;  %v469_v25 = vpop.f32.mrb[14].mxu1 }
  0xf6   :  { %v1698_v26 = vpop.f32.mrb[15].mxu0  ;;  %v1704_v29 = vpop.f32.mrb[15].mxu1  ;;  %v493_v30 = vsel %vm37_vm3, %v2092_v16, 0.0  ;;  %v490_v31 = vsel %vm37_vm3, %v2089_v19, 0.0 }
  0xf7   :  { %494 = vadd.xlane.f32.xlu1 %v493_v30  ;;  %491 = vadd.xlane.f32.xlu0 %v490_v31 }
 0x16c   :  { %v474_v32 = vpop.xlane.xlu0 %473 }
 0x16d   :  { %v496_v27 = vmax.f32 %v474_v32, 1e-09 }
 0x16f   :  { %1807 = vrcp.f32 %v496_v27 }
 0x170   :  { %v477_v35 = vpop.xlane.xlu0 %476 }
 0x171   :  { %v497_v28 = vmax.f32 %v477_v35, 1e-09 }
 0x173   :  { %1809 = vrcp.f32 %v497_v28 }
 0x174   :  { %v480_v36 = vpop.xlane.xlu1 %479 }
 0x175   :  { %v498_v37 = vmax.f32 %v480_v36, 1e-09 }
 0x177   :  { %1811 = vrcp.f32 %v498_v37 }
 0x178   :  { %v483_v38 = vpop.xlane.xlu1 %482 }
 0x179   :  { %v1808_v41 = vpop.eup %1807  ;;  %v499_v42 = vmax.f32 %v483_v38, 1e-09 }
 0x17a   :  { %v2099_v44 = vmul.f32 %v1808_v41, %v2059_v43 }
 0x17b   :  { %1813 = vrcp.f32 %v499_v42 }
 0x17c   :  { %v489_v46 = vpop.xlane.xlu1 %488  ;;  %v486_v47 = vpop.xlane.xlu0 %485  ;;  %v576_v48 = vpack.c.bf16 %v2099_v44, %v2099_v44 }
 0x17d   :  { %v1810_v49 = vpop.eup %1809  ;;  %v501_v50 = vmax.f32 %v489_v46, 1e-09  ;;  %v500_v51 = vmax.f32 %v486_v47, 1e-09 }
 0x17e   :  { %v585_v52 = vsel %vm106_vm0, %v576_v48, 0  ;;  %v2105_v53 = vmul.f32 %v1810_v49, %v2062_v45 }
 0x17f   :  { %1815 = vrcp.f32 %v501_v50  ;;  %1706 = vmatpush3.bf16.msra.mxu0 %v585_v52 }
 0x180   :  { %1817 = vrcp.f32 %v500_v51  ;;  %v577_v43 = vpack.c.bf16 %v2105_v53, %v2105_v53  ;;  %1717 = vmatprep.subr.bf16.mxu0 %v1887_v2 }
 0x181   :  { %v1812_v54 = vpop.eup %1811 }
 0x182   :  { %1708 = vmatmul.mubr.msk.bf16.vlgmr.msra.gmra.mrb[16].mxu0 %vm102_vm2, %v1946_v11  ;;  %v628_v56 = vsel %vm106_vm0, %v577_v43, 0  ;;  %v2114_v58 = vmul.f32 %v1812_v54, %v2069_v55 }
 0x183   :  { %1712 = vmatpush3.bf16.msra.mxu1 %v628_v56  ;;  %1719 = vmatprep.mubr.msk.bf16.mxu0 %vm1888_vm1, %v1887_v2 }
 0x184   :  { %v495_v45 = vpop.xlane.xlu1 %494  ;;  %v492_v59 = vpop.xlane.xlu0 %491  ;;  %v578_v60 = vpack.c.bf16 %v2114_v58, %v2114_v58  ;;  %1723 = vmatprep.subr.bf16.mxu1 %v1887_v2 }
 0x185   :  { %v1814_v61 = vpop.eup %1813  ;;  %v503_v62 = vmax.f32 %v495_v45, 1e-09  ;;  %v502_v63 = vmax.f32 %v492_v59, 1e-09 }
 0x186   :  { %1714 = vmatmul.mubr.msk.bf16.vlgmr.msra.gmra.mrb[16].mxu1 %vm102_vm2, %v1948_v12  ;;  %v671_v55 = vsel %vm106_vm0, %v578_v60, 0  ;;  %v2125_v0 = vmul.f32 %v1814_v61, %v2072_v57 }
 0x187   :  { %1819 = vrcp.f32 %v503_v62  ;;  %1718 = vmatpush3.bf16.msra.mxu0 %v671_v55  ;;  %1725 = vmatprep.mubr.msk.bf16.mxu1 %vm1888_vm1, %v1887_v2 }
 0x188   :  { %1821 = vrcp.f32 %v502_v63  ;;  %v579_v1 = vpack.c.bf16 %v2125_v0, %v2125_v0  ;;  %1729 = vmatprep.subr.bf16.mxu0 %v1887_v2 }
 0x189   :  { %v1816_v3 = vpop.eup %1815 }
 0x18a   :  { %v1818_v6 = vpop.eup %1817  ;;  %1720 = vmatmul.mubr.msk.bf16.vlgmr.msra.gmra.mrb[20].mxu0 %vm102_vm2, %v1988_v23  ;;  %v714_v7 = vsel %vm106_vm0, %v579_v1, 0  ;;  %v2136_v57 = vmul.f32 %v1816_v3, %v2079_v4 }
 0x18b   :  { %1724 = vmatpush3.bf16.msra.mxu1 %v714_v7  ;;  %v2139_v8 = vmul.f32 %v1818_v6, %v2082_v5  ;;  %1731 = vmatprep.mubr.msk.bf16.mxu0 %vm1888_vm1, %v1887_v2 }
 0x18c   :  { %1735 = vmatprep.subr.bf16.mxu1 %v1887_v2  ;;  %v581_v9 = vpack.c.bf16 %v2136_v57, %v2136_v57 }
 0x18d   :  { %v580_v10 = vpack.c.bf16 %v2139_v8, %v2139_v8 }
 0x18e   :  { %1726 = vmatmul.mubr.msk.bf16.vlgmr.msra.gmra.mrb[20].mxu1 %vm102_vm2, %v1990_v24  ;;  %v800_v4 = vsel %vm106_vm0, %v581_v9, 0 }
 0x18f   :  { %v757_v13 = vsel %vm106_vm0, %v580_v10, 0  ;;  %1736 = vmatpush3.bf16.msra.mxu1 %v800_v4  ;;  %1737 = vmatprep.mubr.msk.bf16.mxu1 %vm1888_vm1, %v1887_v2 }
 0x190   :  { %1730 = vmatpush3.bf16.msra.mxu0 %v757_v13  ;;  %1747 = vmatprep.subr.bf16.mxu1 %v1887_v2 }
 0x191   :  { %v1820_v5 = vpop.eup %1819  ;;  %1741 = vmatprep.subr.bf16.mxu0 %v1887_v2 }
 0x192   :  { %v1822_v14 = vpop.eup %1821  ;;  %v2157_v15 = vmul.f32 %v1820_v5, %v2092_v16 }
 0x193   :  { %1732 = vmatmul.mubr.msk.bf16.vlgmr.msra.gmra.mrb[24].mxu0 %vm102_vm2, %v2024_v33  ;;  %v2162_v18 = vmul.f32 %v1822_v14, %v2089_v19 }
 0x194   :  { %v583_v17 = vpack.c.bf16 %v2157_v15, %v2157_v15  ;;  %1743 = vmatprep.mubr.msk.bf16.mxu0 %vm1888_vm1, %v1887_v2 }
 0x195   :  { %v582_v20 = vpack.c.bf16 %v2162_v18, %v2162_v18 }
 0x196   :  { %1738 = vmatmul.mubr.msk.bf16.vlgmr.msra.gmra.mrb[24].mxu1 %vm102_vm2, %v2026_v34  ;;  %v886_v16 = vsel %vm106_vm0, %v583_v17, 0 }
 0x197   :  { %v843_v21 = vsel %vm106_vm0, %v582_v20, 0  ;;  %1748 = vmatpush3.bf16.msra.mxu1 %v886_v16  ;;  %1749 = vmatprep.mubr.msk.bf16.mxu1 %vm1888_vm1, %v1887_v2 }
 0x198   :  { %1742 = vmatpush3.bf16.msra.mxu0 %v843_v21  ;;  %1759 = vmatprep.subr.bf16.mxu1 %v1887_v2 }
 0x199   :  { %1753 = vmatprep.subr.bf16.mxu0 %v1887_v2 }
 0x19b   :  { %1744 = vmatmul.mubr.msk.bf16.vlgmr.msra.gmra.mrb[28].mxu0 %vm102_vm2, %v2046_v39 }
 0x19c   :  { %1755 = vmatprep.mubr.msk.bf16.mxu0 %vm1888_vm1, %v1887_v2 }
 0x19e   :  { %1750 = vmatmul.mubr.msk.bf16.vlgmr.msra.gmra.mrb[28].mxu1 %vm102_vm2, %v2048_v40 }
 0x19f   :  { %1761 = vmatprep.mubr.msk.bf16.mxu1 %vm1888_vm1, %v1887_v2 }
 0x255   :  { %v621_v19 = vpop.f32.mrb[16].mxu0 }
 0x256   :  { %v2187_v22 = vadd.f32 %v621_v19, %v2099_v44  ;;  %v1709_v25 = vpop.f32.mrb[17].mxu0 }
 0x257   :  { %v624_v26 = vpop.f32.mrb[18].mxu0 }
 0x258   :  { %v1710_v29 = vpop.f32.mrb[19].mxu0  ;;  %v928_v30 = vsel %vm37_vm3, %v2187_v22, 0.0 }
 0x259   :  { %v664_v31 = vpop.f32.mrb[16].mxu1  ;;  %929 = vadd.xlane.f32.xlu0 %v928_v30 }
 0x25a   :  { %v2192_v32 = vadd.f32 %v664_v31, %v2105_v53  ;;  %v1715_v27 = vpop.f32.mrb[17].mxu1 }
 0x25b   :  { %v667_v35 = vpop.f32.mrb[18].mxu1 }
 0x25c   :  { %v1716_v28 = vpop.f32.mrb[19].mxu1  ;;  %v931_v36 = vsel %vm37_vm3, %v2192_v32, 0.0 }
 0x25d   :  { %932 = vadd.xlane.f32.xlu1 %v931_v36  ;;  %v707_v37 = vpop.f32.mrb[20].mxu0 }
 0x25e   :  { %v2197_v38 = vadd.f32 %v707_v37, %v2114_v58  ;;  %v1721_v41 = vpop.f32.mrb[21].mxu0 }
 0x25f   :  { %v710_v42 = vpop.f32.mrb[22].mxu0 }
 0x260   :  { %v1722_v46 = vpop.f32.mrb[23].mxu0  ;;  %v934_v47 = vsel %vm37_vm3, %v2197_v38, 0.0 }
 0x261   :  { %v750_v48 = vpop.f32.mrb[20].mxu1  ;;  %935 = vadd.xlane.f32.xlu0 %v934_v47 }
 0x262   :  { %v2202_v49 = vadd.f32 %v750_v48, %v2125_v0  ;;  %v1727_v50 = vpop.f32.mrb[21].mxu1 }
 0x263   :  { %v753_v51 = vpop.f32.mrb[22].mxu1 }
 0x264   :  { %v1728_v52 = vpop.f32.mrb[23].mxu1  ;;  %v937_v43 = vsel %vm37_vm3, %v2202_v49, 0.0 }
 0x265   :  { %938 = vadd.xlane.f32.xlu1 %v937_v43 }
 0x266   :  { %v793_v54 = vpop.f32.mrb[24].mxu0 }
 0x267   :  { %v2207_v56 = vadd.f32 %v793_v54, %v2139_v8  ;;  %v1733_v45 = vpop.f32.mrb[25].mxu0 }
 0x268   :  { %v796_v59 = vpop.f32.mrb[26].mxu0 }
 0x269   :  { %v1734_v60 = vpop.f32.mrb[27].mxu0  ;;  %v836_v61 = vpop.f32.mrb[24].mxu1  ;;  %v940_v62 = vsel %vm37_vm3, %v2207_v56, 0.0 }
 0x26a   :  { %v2212_v63 = vadd.f32 %v836_v61, %v2136_v57  ;;  %941 = vadd.xlane.f32.xlu0 %v940_v62  ;;  %v1739_v55 = vpop.f32.mrb[25].mxu1 }
 0x26b   :  { %v839_v1 = vpop.f32.mrb[26].mxu1 }
 0x26c   :  { %v1740_v3 = vpop.f32.mrb[27].mxu1  ;;  %v943_v6 = vsel %vm37_vm3, %v2212_v63, 0.0 }
 0x26d   :  { %944 = vadd.xlane.f32.xlu1 %v943_v6 }
 0x26e   :  { %v879_v7 = vpop.f32.mrb[28].mxu0 }
 0x26f   :  { %v2217_v9 = vadd.f32 %v879_v7, %v2162_v18  ;;  %v1745_v10 = vpop.f32.mrb[29].mxu0 }
 0x270   :  { %v882_v4 = vpop.f32.mrb[30].mxu0 }
 0x271   :  { %v1746_v13 = vpop.f32.mrb[31].mxu0  ;;  %v922_v5 = vpop.f32.mrb[28].mxu1  ;;  %v946_v14 = vsel %vm37_vm3, %v2217_v9, 0.0 }
 0x272   :  { %v2222_v17 = vadd.f32 %v922_v5, %v2157_v15  ;;  %947 = vadd.xlane.f32.xlu0 %v946_v14  ;;  %v1751_v20 = vpop.f32.mrb[29].mxu1 }
 0x273   :  { %v925_v16 = vpop.f32.mrb[30].mxu1 }
 0x274   :  { %v1752_v21 = vpop.f32.mrb[31].mxu1  ;;  %v949_v19 = vsel %vm37_vm3, %v2222_v17, 0.0 }
 0x275   :  { %950 = vadd.xlane.f32.xlu1 %v949_v19  ;;  %v527_v19 = vsel %vm37_vm3, %v2105_v53, 0.0 }
 0x2e6   :  { %v930_v25 = vpop.xlane.xlu0 %929 }
 0x2e7   :  { %v952_v26 = vmax.f32 %v930_v25, 1e-09 }
 0x2e9   :  { %1823 = vrcp.f32 %v952_v26 }
 0x2ea   :  { %v933_v29 = vpop.xlane.xlu1 %932 }
 0x2eb   :  { %v953_v30 = vmax.f32 %v933_v29, 1e-09 }
 0x2ed   :  { %1825 = vrcp.f32 %v953_v30 }
 0x2ee   :  { %v936_v31 = vpop.xlane.xlu0 %935 }
 0x2ef   :  { %v954_v27 = vmax.f32 %v936_v31, 1e-09 }
 0x2f1   :  { %1827 = vrcp.f32 %v954_v27  ;;  %v534_v27 = vsel %vm37_vm3, %v2114_v58, 0.0 }
 0x2f2   :  { %v939_v35 = vpop.xlane.xlu1 %938 }
 0x2f3   :  { %v1824_v28 = vpop.eup %1823  ;;  %v955_v36 = vmax.f32 %v939_v35, 1e-09 }
 0x2f4   :  { %v2227_v37 = vmul.f32 %v1824_v28, %v2187_v22 }
 0x2f5   :  { %1829 = vrcp.f32 %v955_v36 }
 0x2f6   :  { %v1032_v41 = vpack.c.bf16 %v2227_v37, %v2227_v37 }
 0x2f7   :  { %v1826_v42 = vpop.eup %1825  ;;  %v942_v46 = vpop.xlane.xlu0 %941 }
 0x2f8   :  { %v956_v47 = vmax.f32 %v942_v46, 1e-09  ;;  %v1041_v48 = vsel %vm106_vm0, %v1032_v41, 0  ;;  %v2233_v50 = vmul.f32 %v1826_v42, %v2192_v32  ;;  %v535_v46 = vrot.slane %v534_v27, 4 }
 0x2f9   :  { %1754 = vmatpush3.bf16.msra.mxu0 %v1041_v48 }
 0x2fa   :  { %1831 = vrcp.f32 %v956_v47  ;;  %v945_v51 = vpop.xlane.xlu1 %944  ;;  %v1033_v52 = vpack.c.bf16 %v2233_v50, %v2233_v50  ;;  %1765 = vmatprep.subr.bf16.mxu0 %v1887_v2 }
 0x2fb   :  { %v1828_v22 = vpop.eup %1827  ;;  %v957_v43 = vmax.f32 %v945_v51, 1e-09 }
 0x2fc   :  { %1756 = vmatmul.mubr.msk.bf16.vlgmr.msra.gmra.mrb[32].mxu0 %vm102_vm2, %v1946_v11  ;;  %v1084_v54 = vsel %vm106_vm0, %v1033_v52, 0  ;;  %v2242_v45 = vmul.f32 %v1828_v22, %v2197_v38  ;;  %v541_v52 = vsel %vm37_vm3, %v2125_v0, 0.0  ;;  %v983_v0 = vsel %vm37_vm3, %v2233_v50, 0.0 }
 0x2fd   :  { %1833 = vrcp.f32 %v957_v43  ;;  %1760 = vmatpush3.bf16.msra.mxu1 %v1084_v54  ;;  %1767 = vmatprep.mubr.msk.bf16.mxu0 %vm1888_vm1, %v1887_v2 }
 0x2fe   :  { %v1034_v32 = vpack.c.bf16 %v2242_v45, %v2242_v45  ;;  %1771 = vmatprep.subr.bf16.mxu1 %v1887_v2 }
 0x2ff   :  { %v1830_v59 = vpop.eup %1829  ;;  %v948_v60 = vpop.xlane.xlu0 %947 }
 0x300   :  { %v958_v61 = vmax.f32 %v948_v60, 1e-09  ;;  %1762 = vmatmul.mubr.msk.bf16.vlgmr.msra.gmra.mrb[32].mxu1 %vm102_vm2, %v1948_v12  ;;  %v1127_v11 = vsel %vm106_vm0, %v1034_v32, 0  ;;  %v2253_v38 = vmul.f32 %v1830_v59, %v2202_v49  ;;  %v536_v59 = vadd.f32 %v535_v46, %v534_v27 }
 0x301   :  { %1766 = vmatpush3.bf16.msra.mxu0 %v1127_v11  ;;  %1773 = vmatprep.mubr.msk.bf16.mxu1 %vm1888_vm1, %v1887_v2  ;;  %v542_v11 = vrot.slane %v541_v52, 4 }
 0x302   :  { %1835 = vrcp.f32 %v958_v61  ;;  %v951_v62 = vpop.xlane.xlu1 %950  ;;  %v1035_v55 = vpack.c.bf16 %v2253_v38, %v2253_v38  ;;  %1777 = vmatprep.subr.bf16.mxu0 %v1887_v2 }
 0x303   :  { %v959_v1 = vmax.f32 %v951_v62, 1e-09 }
 0x304   :  { %v1832_v3 = vpop.eup %1831  ;;  %1768 = vmatmul.mubr.msk.bf16.vlgmr.msra.gmra.mrb[36].mxu0 %vm102_vm2, %v1988_v23  ;;  %v1170_v12 = vsel %vm106_vm0, %v1035_v55, 0  ;;  %v548_v55 = vsel %vm37_vm3, %v2139_v8, 0.0  ;;  %v997_v8 = vsel %vm37_vm3, %v2253_v38, 0.0 }
 0x305   :  { %1837 = vrcp.f32 %v959_v1  ;;  %1772 = vmatpush3.bf16.msra.mxu1 %v1170_v12  ;;  %1779 = vmatprep.mubr.msk.bf16.mxu0 %vm1888_vm1, %v1887_v2  ;;  %v2266_v49 = vmul.f32 %v1832_v3, %v2207_v56 }
 0x306   :  { %1783 = vmatprep.subr.bf16.mxu1 %v1887_v2 }
 0x307   :  { %v1834_v6 = vpop.eup %1833  ;;  %v1036_v7 = vpack.c.bf16 %v2266_v49, %v2266_v49 }
 0x308   :  { %1774 = vmatmul.mubr.msk.bf16.vlgmr.msra.gmra.mrb[36].mxu1 %vm102_vm2, %v1990_v24  ;;  %v2274_v23 = vmul.f32 %v1834_v6, %v2212_v63  ;;  %v990_v6 = vsel %vm37_vm3, %v2242_v45, 0.0 }
 0x309   :  { %1785 = vmatprep.mubr.msk.bf16.mxu1 %vm1888_vm1, %v1887_v2  ;;  %v1213_v10 = vsel %vm106_vm0, %v1036_v7, 0 }
 0x30a   :  { %v1037_v56 = vpack.c.bf16 %v2274_v23, %v2274_v23  ;;  %1778 = vmatpush3.bf16.msra.mxu0 %v1213_v10  ;;  %v537_v10 = vrot.slane %v536_v59, 2 }
 0x30b   :  { %1789 = vmatprep.subr.bf16.mxu0 %v1887_v2 }
 0x30c   :  { %v1836_v4 = vpop.eup %1835  ;;  %v1256_v13 = vsel %vm106_vm0, %v1037_v56, 0  ;;  %v976_v56 = vsel %vm37_vm3, %v2227_v37, 0.0 }
 0x30d   :  { %1784 = vmatpush3.bf16.msra.mxu1 %v1256_v13  ;;  %v2284_v24 = vmul.f32 %v1836_v4, %v2217_v9  ;;  %1780 = vmatmul.mubr.msk.bf16.vlgmr.msra.gmra.mrb[40].mxu0 %vm102_vm2, %v2024_v33  ;;  %v549_v4 = vrot.slane %v548_v55, 4  ;;  %v984_v13 = vrot.slane %v983_v0, 4 }
 0x30e   :  { %1795 = vmatprep.subr.bf16.mxu1 %v1887_v2  ;;  %1791 = vmatprep.mubr.msk.bf16.mxu0 %vm1888_vm1, %v1887_v2 }
 0x30f   :  { %v1838_v63 = vpop.eup %1837  ;;  %v1038_v5 = vpack.c.bf16 %v2284_v24, %v2284_v24 }
 0x310   :  { %1786 = vmatmul.mubr.msk.bf16.vlgmr.msra.gmra.mrb[40].mxu1 %vm102_vm2, %v2026_v34  ;;  %v2296_v14 = vmul.f32 %v1838_v63, %v2222_v17  ;;  %v520_v34 = vsel %vm37_vm3, %v2099_v44, 0.0  ;;  %v1004_v63 = vsel %vm37_vm3, %v2266_v49, 0.0 }
 0x311   :  { %v1299_v9 = vsel %vm106_vm0, %v1038_v5, 0  ;;  %1797 = vmatprep.mubr.msk.bf16.mxu1 %vm1888_vm1, %v1887_v2  ;;  %v521_v17 = vrot.slane %v520_v34, 4 }
 0x312   :  { %1790 = vmatpush3.bf16.msra.mxu0 %v1299_v9  ;;  %v1039_v33 = vpack.c.bf16 %v2296_v14, %v2296_v14  ;;  %v991_v9 = vrot.slane %v990_v6, 4 }
 0x313   :  { %v522_v29 = vadd.f32 %v521_v17, %v520_v34  ;;  %v998_v34 = vrot.slane %v997_v8, 4 }
 0x314   :  { %v1342_v20 = vsel %vm106_vm0, %v1039_v33, 0  ;;  %v1011_v33 = vsel %vm37_vm3, %v2274_v23, 0.0 }
 0x315   :  { %1796 = vmatpush3.bf16.msra.mxu1 %v1342_v20  ;;  %1792 = vmatmul.mubr.msk.bf16.vlgmr.msra.gmra.mrb[44].mxu0 %vm102_vm2, %v2046_v39  ;;  %v523_v36 = vrot.slane %v522_v29, 2  ;;  %v1012_v27 = vrot.slane %v1011_v33, 4 }
 0x317   :  { %v2331_v43 = vadd.f32 %v523_v36, %v522_v29  ;;  %v1025_v29 = vsel %vm37_vm3, %v2296_v14, 0.0  ;;  %v569_v36 = vsel %vm37_vm3, %v2157_v15, 0.0 }
 0x318   :  { %1798 = vmatmul.mubr.msk.bf16.vlgmr.msra.gmra.mrb[44].mxu1 %vm102_vm2, %v2048_v40  ;;  %v528_v40 = vrot.slane %v527_v19, 4  ;;  %v1026_v46 = vrot.slane %v1025_v29, 4 }
 0x319   :  { %v525_v12 = vrot.slane %v2331_v43, 1 }
 0x31a   :  { %v529_v42 = vadd.f32 %v528_v40, %v527_v19  ;;  %v562_v19 = vsel %vm37_vm3, %v2162_v18, 0.0 }
 0x31c   :  { %v530_v32 = vrot.slane %v529_v42, 2 }
 0x31e   :  { %v2345_v7 = vadd.f32 %v530_v32, %v529_v42  ;;  %v999_v42 = vadd.f32 %v998_v34, %v997_v8 }
 0x3cf   :  { %v1077_v16 = vpop.f32.mrb[32].mxu0 }
 0x3d0   :  { %v2311_v2 = vadd.f32 %v1077_v16, %v2227_v37  ;;  %v1757_v21 = vpop.f32.mrb[33].mxu0 }
 0x3d1   :  { %v1080_v25 = vpop.f32.mrb[34].mxu0  ;;  %v1018_v21 = vsel %vm37_vm3, %v2284_v24, 0.0 }
 0x3d2   :  { %v1384_v26 = vsel %vm37_vm3, %v2311_v2, 0.0  ;;  %v1758_v39 = vpop.f32.mrb[35].mxu0  ;;  %v1005_v25 = vrot.slane %v1004_v63, 4 }
 0x3d3   :  { %v1120_v30 = vpop.f32.mrb[32].mxu1  ;;  %1385 = vadd.xlane.f32.xlu0 %v1384_v26 }
 0x3d4   :  { %v2318_v44 = vadd.f32 %v1120_v30, %v2233_v50  ;;  %v1763_v31 = vpop.f32.mrb[33].mxu1  ;;  %v2351_v50 = vadd.f32 %v542_v11, %v541_v52  ;;  %v550_v30 = vadd.f32 %v549_v4, %v548_v55  ;;  %v538_v52 = vadd.f32 %v537_v10, %v536_v59 }
 0x3d5   :  { %v1123_v35 = vpop.f32.mrb[34].mxu1  ;;  %v985_v31 = vadd.f32 %v984_v13, %v983_v0  ;;  %v1027_v10 = vadd.f32 %v1026_v46, %v1025_v29 }
 0x3d6   :  { %v1387_v53 = vsel %vm37_vm3, %v2318_v44, 0.0  ;;  %v1764_v28 = vpop.f32.mrb[35].mxu1  ;;  %v551_v11 = vrot.slane %v550_v30, 2 }
 0x3d7   :  { %1388 = vadd.xlane.f32.xlu1 %v1387_v53  ;;  %v1163_v41 = vpop.f32.mrb[36].mxu0  ;;  %v992_v53 = vadd.f32 %v991_v9, %v990_v6  ;;  %v1019_v28 = vrot.slane %v1018_v21, 4 }
 0x3d8   :  { %v2325_v47 = vadd.f32 %v1163_v41, %v2242_v45  ;;  %v1769_v48 = vpop.f32.mrb[37].mxu0  ;;  %v555_v45 = vsel %vm37_vm3, %v2136_v57, 0.0  ;;  %v552_v34 = vadd.f32 %v551_v11, %v550_v30 }
 0x3d9   :  { %v1166_v51 = vpop.f32.mrb[38].mxu0  ;;  %v556_v40 = vrot.slane %v555_v45, 4  ;;  %v563_v48 = vrot.slane %v562_v19, 4  ;;  %v993_v55 = vrot.slane %v992_v53, 2 }
 0x3da   :  { %v1390_v58 = vsel %vm37_vm3, %v2325_v47, 0.0  ;;  %v1770_v22 = vpop.f32.mrb[39].mxu0  ;;  %v532_v51 = vrot.slane %v2345_v7, 1 }
 0x3db   :  { %v1206_v54 = vpop.f32.mrb[36].mxu1  ;;  %1391 = vadd.xlane.f32.xlu0 %v1390_v58  ;;  %v544_v58 = vrot.slane %v2351_v50, 2  ;;  %v1006_v22 = vadd.f32 %v1005_v25, %v1004_v63  ;;  %v564_v4 = vadd.f32 %v563_v48, %v562_v19 }
 0x3dc   :  { %v2334_v60 = vadd.f32 %v1206_v54, %v2253_v38  ;;  %v1775_v61 = vpop.f32.mrb[37].mxu1  ;;  %v977_v38 = vrot.slane %v976_v56, 4  ;;  %v986_v54 = vrot.slane %v985_v31, 2 }
 0x3dd   :  { %v1209_v62 = vpop.f32.mrb[38].mxu1  ;;  %v1013_v61 = vadd.f32 %v1012_v27, %v1011_v33  ;;  %v1007_v9 = vrot.slane %v1006_v22, 2  ;;  %v565_v29 = vrot.slane %v564_v4, 2 }
 0x3de   :  { %v1393_v1 = vsel %vm37_vm3, %v2334_v60, 0.0  ;;  %v1776_v3 = vpop.f32.mrb[39].mxu1  ;;  %v978_v41 = vadd.f32 %v977_v38, %v976_v56  ;;  %v557_v62 = vadd.f32 %v556_v40, %v555_v45  ;;  %v1000_v56 = vrot.slane %v999_v42, 2 }
 0x3df   :  { %1394 = vadd.xlane.f32.xlu1 %v1393_v1  ;;  %v1020_v1 = vadd.f32 %v1019_v28, %v1018_v21  ;;  %v570_v3 = vrot.slane %v569_v36, 4  ;;  %v987_v33 = vadd.f32 %v986_v54, %v985_v31  ;;  %v1014_v38 = vrot.slane %v1013_v61, 2 }
 0x3e0   :  { %v1249_v5 = vpop.f32.mrb[40].mxu0  ;;  %v979_v6 = vrot.slane %v978_v41, 2  ;;  %v533_v40 = vadd.f32 %v532_v51, %v2345_v7  ;;  %v1008_v30 = vadd.f32 %v1007_v9, %v1006_v22  ;;  %v539_v31 = vrot.slane %v538_v52, 1 }
 0x3e1   :  { %v2360_v37 = vadd.f32 %v1249_v5, %v2266_v49  ;;  %v1781_v20 = vpop.f32.mrb[41].mxu0  ;;  %v1021_v19 = vrot.slane %v1020_v1, 2  ;;  %v571_v25 = vadd.f32 %v570_v3, %v569_v36  ;;  %v988_v27 = vrot.slane %v987_v33, 1 }
 0x3e2   :  { %v1252_v16 = vpop.f32.mrb[42].mxu0  ;;  %v553_v36 = vrot.slane %v552_v34, 1  ;;  %v1009_v54 = vrot.slane %v1008_v30, 1 }
 0x3e3   :  { %v1292_v17 = vpop.f32.mrb[40].mxu1  ;;  %v1396_v26 = vsel %vm37_vm3, %v2360_v37, 0.0  ;;  %v1782_v49 = vpop.f32.mrb[43].mxu0  ;;  %v994_v16 = vadd.f32 %v993_v55, %v992_v53  ;;  %v1022_v28 = vadd.f32 %v1021_v19, %v1020_v1 }
 0x3e4   :  { %v2367_v57 = vadd.f32 %v1292_v17, %v2274_v23  ;;  %v1787_v39 = vpop.f32.mrb[41].mxu1  ;;  %1397 = vadd.xlane.f32.xlu0 %v1396_v26  ;;  %v558_v17 = vrot.slane %v557_v62, 2  ;;  %v980_v26 = vadd.f32 %v979_v6, %v978_v41  ;;  %v1001_v49 = vadd.f32 %v1000_v56, %v999_v42 }
 0x3e5   :  { %v1295_v35 = vpop.f32.mrb[42].mxu1  ;;  %v1028_v39 = vrot.slane %v1027_v10, 2  ;;  %v572_v41 = vrot.slane %v571_v25, 2  ;;  %v1023_v11 = vrot.slane %v1022_v28, 1  ;;  %v1010_v56 = vadd.f32 %v1009_v54, %v1008_v30 }
 0x3e6   :  { %v1399_v18 = vsel %vm37_vm3, %v2367_v57, 0.0  ;;  %v1788_v23 = vpop.f32.mrb[43].mxu1  ;;  %v1015_v35 = vadd.f32 %v1014_v38, %v1013_v61  ;;  %v981_v46 = vrot.slane %v980_v26, 1  ;;  %v1002_v42 = vrot.slane %v1001_v49, 1 }
 0x3e7   :  { %1400 = vadd.xlane.f32.xlu1 %v1399_v18  ;;  %v559_v18 = vadd.f32 %v558_v17, %v557_v62  ;;  %v995_v23 = vrot.slane %v994_v16, 1  ;;  %v1029_v48 = vadd.f32 %v1028_v39, %v1027_v10  ;;  %v554_v62 = vadd.f32 %v553_v36, %v552_v34 }
 0x3e8   :  { %v1335_v32 = vpop.f32.mrb[44].mxu0  ;;  %v1016_v7 = vrot.slane %v1015_v35, 1  ;;  %v573_v55 = vadd.f32 %v572_v41, %v571_v25  ;;  %v1003_v1 = vadd.f32 %v1002_v42, %v1001_v49 }
 0x3e9   :  { %v2380_v15 = vadd.f32 %v1335_v32, %v2284_v24  ;;  %v1793_v0 = vpop.f32.mrb[45].mxu0  ;;  %v545_v24 = vadd.f32 %v544_v58, %v2351_v50  ;;  %v526_v50 = vadd.f32 %v525_v12, %v2331_v43  ;;  %v566_v58 = vadd.f32 %v565_v29, %v564_v4 }
 0x3ea   :  { %v1338_v59 = vpop.f32.mrb[46].mxu0  ;;  %v540_v32 = vadd.f32 %v539_v31, %v538_v52  ;;  %v989_v12 = vadd.f32 %v988_v27, %v987_v33  ;;  %v560_v22 = vrot.slane %v559_v18, 1  ;;  %v996_v61 = vadd.f32 %v995_v23, %v994_v16 }
 0x3eb   :  { %v1378_v8 = vpop.f32.mrb[44].mxu1  ;;  %v1402_v63 = vsel %vm37_vm3, %v2380_v15, 0.0  ;;  %v1794_v45 = vpop.f32.mrb[47].mxu0  ;;  %v546_v53 = vrot.slane %v545_v24, 1  ;;  %v1519_v43 = vsel %vm1496_vm4, %v533_v40, %v526_v50  ;;  %v982_v0 = vadd.f32 %v981_v46, %v980_v26 }
 0x3ec   :  { %v2383_v13 = vadd.f32 %v1378_v8, %v2296_v14  ;;  %v1799_v5 = vpop.f32.mrb[45].mxu1  ;;  %1403 = vadd.xlane.f32.xlu0 %v1402_v63  ;;  %v1030_v3 = vrot.slane %v1029_v48, 1  ;;  %v567_v6 = vrot.slane %v566_v58, 1  ;;  %v1520_v8 = vsel %vm1498_vm5, %v540_v32, %v1519_v43 }
 0x3ed   :  { %v1381_v20 = vpop.f32.mrb[46].mxu1  ;;  %v547_v51 = vadd.f32 %v546_v53, %v545_v24  ;;  %v1017_v59 = vadd.f32 %v1016_v7, %v1015_v35  ;;  %v1537_v52 = vsel %vm1496_vm4, %v989_v12, %v982_v0  ;;  %v1024_v4 = vadd.f32 %v1023_v11, %v1022_v28 }
 0x3ee   :  { %v1405_v14 = vsel %vm37_vm3, %v2383_v13, 0.0  ;;  %v1800_v21 = vpop.f32.mrb[47].mxu1  ;;  %v1538_v63 = vsel %vm1498_vm5, %v996_v61, %v1537_v52  ;;  %v561_v5 = vadd.f32 %v560_v22, %v559_v18  ;;  %v574_v45 = vrot.slane %v573_v55, 1 }
 0x3ef   :  { %1406 = vadd.xlane.f32.xlu1 %v1405_v14  ;;  %v1521_v10 = vsel %vm1500_vm6, %v547_v51, %v1520_v8  ;;  %v1031_v9 = vadd.f32 %v1030_v3, %v1029_v48  ;;  %v1539_v24 = vsel %vm1500_vm6, %v1003_v1, %v1538_v63  ;;  %v568_v33 = vadd.f32 %v567_v6, %v566_v58 }
 0x3f0   :  { %v1522_v20 = vsel %vm1502_vm7, %v554_v62, %v1521_v10  ;;  %v1540_v38 = vsel %vm1502_vm7, %v1010_v56, %v1539_v24  ;;  %v575_v16 = vadd.f32 %v574_v45, %v573_v55 }
 0x3f1   :  { %v1541_v34 = vsel %vm1504_vm8, %v1017_v59, %v1540_v38  ;;  %v1523_v14 = vsel %vm1504_vm8, %v561_v5, %v1522_v20 }
 0x3f2   :  { %v1542_v17 = vsel %vm1506_vm9, %v1024_v4, %v1541_v34  ;;  %v1524_v19 = vsel %vm1506_vm9, %v568_v33, %v1523_v14 }
 0x3f3   :  { %v1543_v21 = vsel %vm1508_vm10, %v1031_v9, %v1542_v17  ;;  %v1525_v25 = vsel %vm1508_vm10, %v575_v16, %v1524_v19 }
 0x400   :  { %1544 = vrot.lane.b32.xlu1 %v1543_v21, %s1889_s0 }
 0x402   :  { %1526 = vrot.lane.b32.xlu0 %v1525_v25, %s1890_s13 }
 0x460   :  { %v1386_v26 = vpop.xlane.xlu0 %1385 }
 0x461   :  { %v1408_v29 = vmax.f32 %v1386_v26, 1e-09 }
 0x464   :  { %v1389_v49 = vpop.xlane.xlu1 %1388 }
 0x465   :  { %v1409_v39 = vmax.f32 %v1389_v49, 1e-09 }
 0x467   :  { %1839 = vrcp.f32 %v1409_v39 }
 0x468   :  { %v1392_v50 = vpop.xlane.xlu0 %1391  ;;  %1841 = vrcp.f32 %v1408_v29 }
 0x469   :  { %v1410_v40 = vmax.f32 %v1392_v50, 1e-09 }
 0x46b   :  { %1843 = vrcp.f32 %v1410_v40 }
 0x46c   :  { %v1395_v30 = vpop.xlane.xlu1 %1394 }
 0x46d   :  { %v1411_v31 = vmax.f32 %v1395_v30, 1e-09 }
 0x46f   :  { %1845 = vrcp.f32 %v1411_v31 }
 0x471   :  { %v1840_v27 = vpop.eup %1839  ;;  %v1398_v35 = vpop.xlane.xlu0 %1397 }
 0x472   :  { %v1412_v53 = vmax.f32 %v1398_v35, 1e-09  ;;  %v1842_v18 = vpop.eup %1841  ;;  %v1425_v36 = vmul.f32 %v1840_v27, %v2318_v44 }
 0x473   :  { %v1424_v42 = vmul.f32 %v1842_v18, %v2311_v2 }
 0x474   :  { %v1401_v23 = vpop.xlane.xlu1 %1400  ;;  %1847 = vrcp.f32 %v1412_v53  ;;  %v1439_v58 = vsel %vm37_vm3, %v1425_v36, 0.0 }
 0x475   :  { %v1844_v28 = vpop.eup %1843  ;;  %v1413_v41 = vmax.f32 %v1401_v23, 1e-09  ;;  %v1432_v12 = vsel %vm37_vm3, %v1424_v42, 0.0  ;;  %v1440_v51 = vrot.slane %v1439_v58, 4 }
 0x476   :  { %v1426_v46 = vmul.f32 %v1844_v28, %v2325_v47  ;;  %v1433_v47 = vrot.slane %v1432_v12, 4 }
 0x477   :  { %1849 = vrcp.f32 %v1413_v41  ;;  %v1441_v55 = vadd.f32 %v1440_v51, %v1439_v58 }
 0x478   :  { %v1446_v54 = vsel %vm37_vm3, %v1426_v46, 0.0  ;;  %v1434_v3 = vadd.f32 %v1433_v47, %v1432_v12 }
 0x479   :  { %v1846_v48 = vpop.eup %1845  ;;  %v1404_v43 = vpop.xlane.xlu0 %1403  ;;  %v1447_v61 = vrot.slane %v1446_v54, 4  ;;  %v1442_v52 = vrot.slane %v1441_v55, 2 }
 0x47a   :  { %v1427_v32 = vmul.f32 %v1846_v48, %v2334_v60  ;;  %v1414_v7 = vmax.f32 %v1404_v43, 1e-09  ;;  %v1435_v45 = vrot.slane %v1434_v3, 2 }
 0x47b   :  { %v1448_v60 = vadd.f32 %v1447_v61, %v1446_v54  ;;  %v1443_v20 = vadd.f32 %v1442_v52, %v1441_v55  ;;  %v1856_v55 = vld [vmem:[%s2485_s1 + $0x8] sm:$0xff] }
 0x47c   :  { %v1453_v44 = vsel %vm37_vm3, %v1427_v32, 0.0  ;;  %v1407_v22 = vpop.xlane.xlu1 %1406  ;;  %1851 = vrcp.f32 %v1414_v7  ;;  %v1436_v14 = vadd.f32 %v1435_v45, %v1434_v3  ;;  %v1857_v3 = vld [vmem:[%s2485_s1 + $0x10] sm:$0xff] }
 0x47d   :  { %v1454_v2 = vrot.slane %v1453_v44, 4  ;;  %v1415_v11 = vmax.f32 %v1407_v22, 1e-09  ;;  %v1449_v4 = vrot.slane %v1448_v60, 2  ;;  %v1444_v49 = vrot.slane %v1443_v20, 1 }
 0x47e   :  { %v1848_v62 = vpop.eup %1847  ;;  %v1437_v30 = vrot.slane %v1436_v14, 1 }
 0x47f   :  { %v1428_v0 = vmul.f32 %v1848_v62, %v2360_v37  ;;  %1853 = vrcp.f32 %v1415_v11  ;;  %v1455_v6 = vadd.f32 %v1454_v2, %v1453_v44  ;;  %v1450_v34 = vadd.f32 %v1449_v4, %v1448_v60  ;;  %v1855_v11 = vld [vmem:[%s2485_s1] sm:$0xff] }
 0x480   :  { %v1445_v53 = vadd.f32 %v1444_v49, %v1443_v20  ;;  %v1438_v41 = vadd.f32 %v1437_v30, %v1436_v14  ;;  %v38_v62 = vsel %vm37_vm3, %v1855_v11, 0.0 }
 0x481   :  { %v1850_v1 = vpop.eup %1849  ;;  %v1460_v56 = vsel %vm37_vm3, %v1428_v0, 0.0  ;;  %v1456_v9 = vrot.slane %v1455_v6, 2  ;;  %v1451_v29 = vrot.slane %v1450_v34, 1  ;;  %v45_v0 = vsel %vm37_vm3, %v1856_v55, 0.0 }
 0x482   :  { %v1429_v8 = vmul.f32 %v1850_v1, %v2367_v57  ;;  %v1461_v59 = vrot.slane %v1460_v56, 4  ;;  %v1555_v32 = vsel %vm1496_vm4, %v1445_v53, %v1438_v41  ;;  %v39_v1 = vrot.slane %v38_v62, 4 }
 0x483   :  { %v1457_v57 = vadd.f32 %v1456_v9, %v1455_v6  ;;  %v1452_v28 = vadd.f32 %v1451_v29, %v1450_v34  ;;  %v46_v60 = vrot.slane %v45_v0, 4  ;;  %v52_v6 = vsel %vm37_vm3, %v1857_v3, 0.0 }
 0x484   :  { %v1467_v10 = vsel %vm37_vm3, %v1429_v8, 0.0  ;;  %v1462_v63 = vadd.f32 %v1461_v59, %v1460_v56  ;;  %v53_v56 = vrot.slane %v52_v6, 4  ;;  %v1858_v8 = vld [vmem:[%s2485_s1 + $0x18] sm:$0xff]  ;;  %v40_v52 = vadd.f32 %v39_v1, %v38_v62 }
 0x485   :  { %v1468_v5 = vrot.slane %v1467_v10, 4  ;;  %v1458_v31 = vrot.slane %v1457_v57, 1  ;;  %v1556_v12 = vsel %vm1498_vm5, %v1452_v28, %v1555_v32  ;;  %v59_v59 = vsel %vm37_vm3, %v1858_v8, 0.0 }
 0x486   :  { %v1852_v24 = vpop.eup %1851  ;;  %v1463_v37 = vrot.slane %v1462_v63, 2  ;;  %v60_v4 = vrot.slane %v59_v59, 4  ;;  %v54_v45 = vadd.f32 %v53_v56, %v52_v6  ;;  %v41_v9 = vrot.slane %v40_v52, 2  ;;  %v1527_v6 = vpop.permute.xlu0 %1526 }
 0x487   :  { %v1469_v33 = vadd.f32 %v1468_v5, %v1467_v10  ;;  %v1430_v38 = vmul.f32 %v1852_v24, %v2380_v15  ;;  %v47_v10 = vadd.f32 %v46_v60, %v45_v0  ;;  %v1545_v56 = vpop.permute.xlu1 %1544 }
 0x488   :  { %v1464_v25 = vadd.f32 %v1463_v37, %v1462_v63  ;;  %v1859_v63 = vld [vmem:[%s2485_s1 + $0x20] sm:$0xff]  ;;  %v55_v34 = vrot.slane %v54_v45, 2 }
 0x489   :  { %v1470_v17 = vrot.slane %v1469_v33, 2  ;;  %v1854_v16 = vpop.eup %1853  ;;  %v1474_v21 = vsel %vm37_vm3, %v1430_v38, 0.0  ;;  %v66_v5 = vsel %vm37_vm3, %v1859_v63, 0.0  ;;  %v48_v24 = vrot.slane %v47_v10, 2 }
 0x48a   :  { %v1431_v19 = vmul.f32 %v1854_v16, %v2383_v13  ;;  %v1475_v26 = vrot.slane %v1474_v21, 4  ;;  %v1465_v27 = vrot.slane %v1464_v25, 1  ;;  %v1459_v13 = vadd.f32 %v1458_v31, %v1457_v57  ;;  %v1861_v57 = vld [vmem:[%s2485_s1 + $0x30] sm:$0xff] }
 0x48b   :  { %v1471_v39 = vadd.f32 %v1470_v17, %v1469_v33  ;;  %v67_v37 = vrot.slane %v66_v5, 4  ;;  %v1860_v33 = vld [vmem:[%s2485_s1 + $0x28] sm:$0xff]  ;;  %v61_v38 = vadd.f32 %v60_v4, %v59_v59  ;;  %v42_v17 = vadd.f32 %v41_v9, %v40_v52 }
 0x48c   :  { %v1476_v50 = vadd.f32 %v1475_v26, %v1474_v21  ;;  %v1481_v40 = vsel %vm37_vm3, %v1431_v19, 0.0  ;;  %v1466_v42 = vadd.f32 %v1465_v27, %v1464_v25  ;;  %v1557_v51 = vsel %vm1500_vm6, %v1459_v13, %v1556_v12 }
 0x48d   :  { %v1482_v15 = vrot.slane %v1481_v40, 4  ;;  %v1472_v18 = vrot.slane %v1471_v39, 1  ;;  %v73_v20 = vsel %vm37_vm3, %v1860_v33, 0.0  ;;  %v49_v16 = vadd.f32 %v48_v24, %v47_v10 }
 0x48e   :  { %v1477_v35 = vrot.slane %v1476_v50, 2  ;;  %v1558_v44 = vsel %vm1502_vm7, %v1466_v42, %v1557_v51  ;;  %v74_v14 = vrot.slane %v73_v20, 4  ;;  %v80_v21 = vsel %vm37_vm3, %v1861_v57, 0.0 }
 0x48f   :  { %v1483_v23 = vadd.f32 %v1482_v15, %v1481_v40  ;;  %v1473_v58 = vadd.f32 %v1472_v18, %v1471_v39  ;;  %v68_v19 = vadd.f32 %v67_v37, %v66_v5  ;;  %v62_v25 = vrot.slane %v61_v38, 2  ;;  %v1862_v39 = vld [vmem:[%s2485_s1 + $0x38] sm:$0xff]  ;;  %s1892_s1 = smov [#allocation2]  }
 0x490   :  { %v1478_v36 = vadd.f32 %v1477_v35, %v1476_v50  ;;  %v56_v26 = vadd.f32 %v55_v34, %v54_v45  ;;  %v81_v49 = vrot.slane %v80_v21, 4  ;;  %v87_v29 = vsel %vm37_vm3, %v1862_v39, 0.0  ;;  %s1577_s3 = sshll.u32 %s1892_s1, 4  ;;  %s1578_s3 = int_to_ptr.vmem [resolvable:$true] %s1577_s3 }
 0x491   :  { %v1484_v46 = vrot.slane %v1483_v23, 2  ;;  %v1559_v61 = vsel %vm1504_vm8, %v1473_v58, %v1558_v44  ;;  %v43_v50 = vrot.slane %v42_v17, 1  ;;  %v50_v40 = vrot.slane %v49_v16, 1  ;;  %s1863_s4 = scalar_lea.vmem %s1578_s3, 128  ;;  %p1868_p1 = scmp.lt.s32.totalorder %s1578_s3, %s1578_s3 }
 0x492   :  { %v1479_v48 = vrot.slane %v1478_v36, 1  ;;  %v75_v30 = vadd.f32 %v74_v14, %v73_v20  ;;  %v69_v31 = vrot.slane %v68_v19, 2  ;;  %v63_v15 = vadd.f32 %v62_v25, %v61_v38  ;;  %p1864_p0 = scmp.ne.s32.totalorder %s1578_s3, %s1863_s4  ;;  %p1869_p2 = scmp.lt.s32.totalorder %s1863_s4, %s1863_s4 }
 0x493   :  { %v1485_v54 = vadd.f32 %v1484_v46, %v1483_v23  ;;  %v88_v27 = vrot.slane %v87_v29, 4  ;;  %v57_v35 = vrot.slane %v56_v26, 1  ;;  %v82_v53 = vadd.f32 %v81_v49, %v80_v21 }
 0x494   :  { %v1480_v43 = vadd.f32 %v1479_v48, %v1478_v36  ;;  %v44_v18 = vadd.f32 %v43_v50, %v42_v17  ;;  %v51_v23 = vadd.f32 %v50_v40, %v49_v16  ;;  %v76_v28 = vrot.slane %v75_v30, 2  ;;  %p1870_p3 = por %p1869_p2, %p1868_p1 }
 0x495   :  { %v1486_v7 = vrot.slane %v1485_v54, 1  ;;  %v70_v36 = vadd.f32 %v69_v31, %v68_v19  ;;  %v64_v41 = vrot.slane %v63_v15, 1  ;;  %v89_v13 = vadd.f32 %v88_v27, %v87_v29 }
 0x496   :  { %v1560_v47 = vsel %vm1506_vm9, %v1480_v43, %v1559_v61  ;;  %v58_v46 = vadd.f32 %v57_v35, %v56_v26  ;;  %v83_v42 = vrot.slane %v82_v53, 2  ;;  %v1497_v48 = vsel %vm1496_vm4, %v51_v23, %v44_v18  ;;  %p1871_p4 = pnand %p1870_p3, %p1864_p0 }
 0x497   :  { %v1487_v22 = vadd.f32 %v1486_v7, %v1485_v54  ;;  %v77_v58 = vadd.f32 %v76_v28, %v75_v30  ;;  %v71_v54 = vrot.slane %v70_v36, 1  ;;  %v65_v32 = vadd.f32 %v64_v41, %v63_v15 }
 0x498   :  { %v90_v43 = vrot.slane %v89_v13, 2  ;;  %v84_v12 = vadd.f32 %v83_v42, %v82_v53  ;;  %v1499_v7 = vsel %vm1498_vm5, %v58_v46, %v1497_v48 }
 0x499   :  { %v1561_v2 = vsel %vm1508_vm10, %v1487_v22, %v1560_v47  ;;  %v78_v51 = vrot.slane %v77_v58, 1  ;;  %v72_v44 = vadd.f32 %v71_v54, %v70_v36  ;;  %v1501_v61 = vsel %vm1500_vm6, %v65_v32, %v1499_v7 }
 0x49a   :  { %1562 = vrot.lane.b32.xlu1 %v1561_v2, %s1891_s14  ;;  %v91_v22 = vadd.f32 %v90_v43, %v89_v13  ;;  %v85_v47 = vrot.slane %v84_v12, 1 }
 0x49b   :  { %v79_v2 = vadd.f32 %v78_v51, %v77_v58  ;;  %v1503_v11 = vsel %vm1502_vm7, %v72_v44, %v1501_v61 }
 0x49c   :  { %v92_v62 = vrot.slane %v91_v22, 1  ;;  %v86_v55 = vadd.f32 %v85_v47, %v84_v12 }
 0x49d   :  { %v1505_v0 = vsel %vm1504_vm8, %v79_v2, %v1503_v11 }
 0x49e   :  { %v93_v1 = vadd.f32 %v92_v62, %v91_v22  ;;  %v1507_v60 = vsel %vm1506_vm9, %v86_v55, %v1505_v0 }
 0x4a0   :  { %v1509_v3 = vsel %vm1508_vm10, %v93_v1, %v1507_v60 }
 0x4a1   :  { %v1565_v8 = vsel %vm37_vm3, %v1509_v3, %v1527_v6 }
 0x4a2   :  { %v1566_v59 = vsel %vm102_vm2, %v1565_v8, %v1545_v56 }
 0x50c   :  { %v1563_v52 = vpop.permute.xlu1 %1562 }
 0x50d   :  { %v1568_v10 = vsel %vm1567_vm11, %v1566_v59, %v1563_v52 }
 0x50e   :  { %1570 = vst.msk [vmem:[#allocation2] sm:$0xff] %vm1569_vm12, %v1568_v10 }
 0x50f   :  { %1874 = shalt.err (!%p1871_p4)
}
 0x510   :  { %s1875_s7 = scalar_lea.hbm %s2486_s2, 128 }
 0x511   :  { %p1876_p5 = scmp.ne.s32.totalorder %s2486_s2, %s1875_s7  ;;  %p1879_p6 = scmp.lt.u32.totalorder %s1875_s7, %s2486_s2 }
 0x513   :  { %p1881_p7 = pnand %p1879_p6, %p1876_p5 }
 0x515   :  { %1884 = shalt.err (!%p1881_p7)
}
 0x516   :  { %1580 = dma.vmem_to_hbm [thread:$0]  %s1578_s3, 128, %s2486_s2, [#allocation3]  }
 0x517   :  { %1885 = dma.done.wait [#allocation3], 128  }
 0x518   :  { %1886 = vsyncadd [#allocation3], 4294967168 }
 0x519   :  { %1584 = vsyncpa [#allocation3], 1 }

</bundles_post_ra>
